<compile_context>
chip_gen: v7x
topology: tpu7x:2x2x1
jax: 0.10.0
libtpu: 0.0.40
codegen_flags: <defaults>
</compile_context>

<pallas_src>
import jax
import jax.numpy as jnp
from jax.experimental import pallas as pl
from jax.experimental.pallas import tpu as pltpu


_LANE = 128
_DEFAULT_VMEM_LIMIT = 48 * 1024 * 1024   # leaves headroom under v7x's 64 MiB physical VMEM
_MIN_MULTISTEP_BYTES = 1 << 20           # arrays above this get a multi-step grid


def _relu_kernel(x_ref, o_ref):
    # VPU elementwise max against a scalar zero (no full-tile zeros constant).
    x = x_ref[...]
    o_ref[...] = jnp.maximum(x, jnp.zeros((), dtype=x.dtype))


def _min_sublanes(itemsize: int) -> int:
    # Native packing tile: (8,128) f32, (16,128) bf16/f16, (32,128) int8/fp8.
    return {4: 8, 2: 16, 1: 32}.get(itemsize, 8)


def _hw_budget():
    """(target_block_bytes, vmem_limit_bytes), generation-aware where possible."""
    phys = 128 * 1024 * 1024
    try:
        info = pltpu.get_tpu_info()
        phys = int(getattr(info, "vmem_capacity_bytes", phys))
    except Exception:
        pass
    # Explicit scoped-VMEM limit: never rely on the default (v5e default is
    # 16 MiB, exactly one 4 MiB-block double-buffered working set).
    vmem_limit = min(_DEFAULT_VMEM_LIMIT, (phys * 3) // 4)
    # in + out, each double-buffered -> 4 live block buffers; keep them within
    # ~2/3 of the scoped limit to leave room for Mosaic internal scratch.
    target_block = max(1 << 20, (vmem_limit * 2 // 3) // 4)   # 8 MiB at 48 MiB limit
    return target_block, vmem_limit


def _choose_cols(n: int, min_sub: int):
    """Widest lane-dense column count that divides n with no padding."""
    candidates = (2048, 1024, 512, 256, 128)
    for c in candidates:
        if n % c == 0 and (n // c) >= min_sub:
            return c
    for c in candidates:
        if n % c == 0:
            return c
    return None


def _pick_tile_rows(rows: int, cols: int, itemsize: int, min_sub: int,
                    target_block: int) -> int:
    bytes_per_row = cols * itemsize
    total_bytes = rows * bytes_per_row
    # Largest multiple of the dtype's native sublane count within the byte target.
    tile = max(min_sub, ((target_block // bytes_per_row) // min_sub) * min_sub)
    if total_bytes > _MIN_MULTISTEP_BYTES:
        # Keep >= ~4 grid steps so v7x's two TensorCores both get work and the
        # BlockSpec pipeline has DMA to overlap, even on mid-size activations.
        cap = max(min_sub, (pl.cdiv(rows, 4) // min_sub) * min_sub)
        tile = min(tile, cap)
    if tile >= rows:
        # Single block covering the full array: block_shape == array shape is
        # always legal regardless of (8,128) divisibility.
        return rows
    return tile


def _relu_call(x2d: jax.Array, block_shape, index_map, grid, vmem_limit: int) -> jax.Array:
    # TODO(synk): could add input_output_aliases={0: 0} when the caller donates x
    # (aten.relu.default is not in-place, so it is not aliased unconditionally).
    return pl.pallas_call(
        _relu_kernel,
        out_shape=jax.ShapeDtypeStruct(x2d.shape, x2d.dtype),
        grid_spec=pltpu.PrefetchScalarGridSpec(
            num_scalar_prefetch=0,
            grid=grid,
            in_specs=[pl.BlockSpec(block_shape, index_map)],
            out_specs=pl.BlockSpec(block_shape, index_map),
        ),
        compiler_params=pltpu.CompilerParams(
            dimension_semantics=("parallel",),
            vmem_limit_bytes=vmem_limit,
        ),
    )(x2d)


def relu_pallas(x: jax.Array) -> jax.Array:
    """Matches torch.ops.aten.relu.default: elementwise max(x, 0), same shape/dtype."""
    orig_shape = x.shape
    dtype = x.dtype
    n = x.size
    if n == 0:
        return x

    itemsize = jnp.dtype(dtype).itemsize
    min_sub = _min_sublanes(itemsize)
    target_block, vmem_limit = _hw_budget()

    cols = _choose_cols(n, min_sub)
    if cols is None:
        # n not a multiple of 128: no-copy (1, n) view tiled along the lane axis.
        # Sublane dim 1 equals the full array dim, lane tile is a multiple of 128
        # (or the full n), and the cdiv grid lets Pallas mask the partial last
        # block — no pad/slice HBM passes.
        x2d = x.reshape(1, n)
        if n <= _LANE:
            tile_cols = n
        else:
            # Budget assumes the (1, tile) block pads to min_sub sublanes in VMEM.
            budget = max(_LANE, target_block // (min_sub * itemsize))
            tile_cols = max(_LANE, (budget // _LANE) * _LANE)
            if tile_cols >= n:
                tile_cols = n
        grid = (pl.cdiv(n, tile_cols),)
        out2d = _relu_call(x2d, (1, tile_cols), lambda i: (0, i), grid, vmem_limit)
        return out2d.reshape(orig_shape)

    # Common path: only free reshapes of a contiguous array — no HBM pad copies.
    rows = n // cols
    x2d = x.reshape(rows, cols)
    tile_rows = _pick_tile_rows(rows, cols, itemsize, min_sub, target_block)
    grid = (pl.cdiv(rows, tile_rows),)
    out2d = _relu_call(x2d, (tile_rows, cols), lambda i: (i, 0), grid, vmem_limit)
    return out2d.reshape(orig_shape)


if __name__ == "__main__":
    relu = jax.jit(relu_pallas)

    key = jax.random.PRNGKey(0)

    # Primary check: small NCHW activation consistent with a densenet feature map.
    x = jax.random.normal(key, (2, 4, 16, 16), dtype=jnp.float32)
    y = relu(x)
    jax.block_until_ready(y)
    assert y.shape == x.shape and y.dtype == x.dtype
    assert bool(jnp.allclose(y, jnp.maximum(x, 0.0))), "mismatch vs reference relu (f32)"

    # Row count not a multiple of 8 (single full-array block path).
    x2 = jax.random.normal(jax.random.PRNGKey(1), (2, 3, 56, 56), dtype=jnp.float32)
    y2 = relu(x2)
    jax.block_until_ready(y2)
    assert bool(jnp.allclose(y2, jnp.maximum(x2, 0.0))), "mismatch vs reference relu (odd rows)"

    # Mid-size tensor (> 1 MiB): exercises the multi-step "parallel" grid + masked tail.
    x3 = jax.random.normal(jax.random.PRNGKey(2), (2, 64, 56, 56), dtype=jnp.float32)
    y3 = relu(x3)
    jax.block_until_ready(y3)
    assert bool(jnp.allclose(y3, jnp.maximum(x3, 0.0))), "mismatch vs reference relu (mid-size)"

    # Element count not a multiple of 128: no-copy lane-tiled fallback path.
    x4 = jax.random.normal(jax.random.PRNGKey(3), (7, 13), dtype=jnp.float32)
    y4 = relu(x4)
    jax.block_until_ready(y4)
    assert bool(jnp.allclose(y4, jnp.maximum(x4, 0.0))), "mismatch vs reference relu (ragged)"

    # bf16 path (16-sublane native packing tile).
    x5 = jax.random.normal(jax.random.PRNGKey(4), (2, 4, 16, 16), dtype=jnp.bfloat16)
    y5 = relu(x5)
    jax.block_until_ready(y5)
    assert y5.dtype == x5.dtype
    assert bool(jnp.allclose(y5, jnp.maximum(x5, jnp.zeros((), jnp.bfloat16)))), "mismatch (bf16)"

    print("KERNEL_OK")
</pallas_src>

<mosaic_0001>
module attributes {stable_mosaic.version = 11 : i64} {
  func.func @_relu_kernel(%arg0: i32, %arg1: memref<8x256xf32, #tpu.memory_space<vmem>>, %arg2: memref<8x256xf32, #tpu.memory_space<vmem>>) attributes {dimension_semantics = [#tpu.dimension_semantics<parallel>], iteration_bounds = array<i64: 1>, scalar_prefetch = 0 : i64, scratch_operands = 0 : i64, tpu.core_type = #tpu.core_type<tc>, window_params = [{transform_indices = @transform_0, window_bounds = array<i64: 8, 256>}, {transform_indices = @transform_1, window_bounds = array<i64: 8, 256>}]} {
    %c0 = arith.constant 0 : index
    %c0_0 = arith.constant 0 : index
    %0 = vector.load %arg1[%c0, %c0_0] : memref<8x256xf32, #tpu.memory_space<vmem>>, vector<8x256xf32>
    %cst = arith.constant 0.000000e+00 : f32
    %1 = vector.broadcast %cst : f32 to vector<8x256xf32>
    %2 = arith.maximumf %0, %1 : vector<8x256xf32>
    %c0_1 = arith.constant 0 : index
    %c0_2 = arith.constant 0 : index
    %3 = vector.load %arg2[%c0_1, %c0_2] : memref<8x256xf32, #tpu.memory_space<vmem>>, vector<8x256xf32>
    tpu.vector_store %arg2[%c0_1, %c0_2], %2 {strides = array<i32>} : memref<8x256xf32, #tpu.memory_space<vmem>>, vector<8x256xf32>,
    return
  }
  func.func @transform_0(%arg0: i32) -> (i32, i32) {
    %c0_i32 = arith.constant 0 : i32
    %c0_i32_0 = arith.constant 0 : i32
    return %arg0, %c0_i32 : i32, i32
  }
  func.func @transform_1(%arg0: i32) -> (i32, i32) {
    %c0_i32 = arith.constant 0 : i32
    %c0_i32_0 = arith.constant 0 : i32
    return %arg0, %c0_i32 : i32, i32
  }
}

</mosaic_0001>

<bundles_post_ra>
// kernel: relu_pallas.1
= control target key start
LH: loop header
LB: loop body
LE: loop exit
PB: predicated region body
PF: predicated region fallthrough
CT: control target
= control target key end

     0   :  { %s40_s0 = inlined_call_operand.vmem [shape: f32[8,256], index: 0, kind: input, shape index: {}]   ;;  %s41_s1 = inlined_call_operand.vmem [shape: f32[8,256], index: 1, kind: output, shape index: {}]  }
   0x1   :  { %v8_v0 = vld [vmem:[%s40_s0] sm:$0xff]  ;;  %v9_v1 = vld [vmem:[%s40_s0 + $0x8] sm:$0xff] }
   0x2   :  { %v10_v2 = vmax.f32 %v8_v0, 0.0  ;;  %v11_v3 = vmax.f32 %v9_v1, 0.0 }
   0x4   :  { %12 = vst [vmem:[%s41_s1] sm:$0xff] %v10_v2  ;;  %13 = vst [vmem:[%s41_s1 + $0x8] sm:$0xff] %v11_v3 }

</bundles_post_ra>
